<compile_context>
chip_gen: v7x
topology: tpu7x:2x2x1
jax: 0.10.0
libtpu: 0.0.40
codegen_flags: <defaults>
</compile_context>

<pallas_src>
import jax
import jax.numpy as jnp
from jax.experimental import pallas as pl
from jax.experimental.pallas import tpu as pltpu


def weighted_average_kernel(h_ref, w1_ref, b1_ref, w2_ref, b2_ref, o_ref):
    TB, S, D = h_ref.shape
    SZ = w1_ref.shape[1]

    h = h_ref[...]                                    # native dtype, no upcast
    h2d = h.reshape(TB * S, D)                        # fill the MXU M dimension

    # scorer layer 1 on the MXU (f32 accumulation): tanh(h @ W1 + b1)
    z = jnp.tanh(
        jnp.dot(h2d, w1_ref[...], preferred_element_type=jnp.float32)
        + b1_ref[...].astype(jnp.float32)             # (1, SZ) broadcasts
    )                                                 # (TB*S, SZ) f32

    # scorer layer 2 (N=1 matvec) on the VPU: broadcast multiply + lane reduce.
    # keepdims keeps the score a per-row column -> no flip to S-on-lanes.
    s = (
        jnp.sum(z * w2_ref[...].astype(jnp.float32), axis=-1, keepdims=True)
        + b2_ref[...].astype(jnp.float32)
    ).reshape(TB, S, 1)                               # (TB, S, 1)

    # softmax over the sequence (sublane axis), column layout throughout
    m = jnp.max(s, axis=1, keepdims=True)             # (TB, 1, 1)
    e = jnp.exp(s - m)                                # (TB, S, 1)
    denom = jnp.sum(e, axis=1, keepdims=True)         # (TB, 1, 1)
    alpha = e * pl.reciprocal(denom, approx=True)     # (TB, S, 1)

    # weighted average over the sequence; alpha broadcasts along D (lanes),
    # the product promotes to f32 so the S-reduction accumulates in f32.
    out = jnp.sum(alpha * h, axis=1)                  # (TB, D)
    o_ref[...] = out.astype(o_ref.dtype)


def _choose_tb(B, S, D, SZ, itemsize, budget_bytes=28 << 20):
    """Largest batch tile (multiple of 8) whose working set fits the budget."""
    per_row = (
        2 * S * D * itemsize      # double-buffered h input tile
        + S * SZ * 4              # z (f32)
        + S * D * 4               # alpha * h f32 product
        + 2 * D * itemsize        # double-buffered output row
        + 64                      # score / softmax columns, slack
    )
    tb = int(budget_bytes // max(per_row, 1))
    tb = max(8, min(512, (tb // 8) * 8))
    Bp = ((B + 7) // 8) * 8
    tb = min(tb, Bp)
    # keep >= 2 grid steps when possible so ("parallel",) can shard the batch
    # axis across both TensorCores on 2-TC chips (v7x)
    if Bp // tb < 2 and Bp >= 16:
        tb = max(8, ((Bp // 2) // 8) * 8)
    return tb


def weighted_average(h, w1, b1, w2, b2, *, tb=None):
    """h: (B, S, D); w1: (D, SZ); b1: (1, SZ); w2: (SZ, 1); b2: (1, 1)."""
    B, S, D = h.shape
    SZ = w1.shape[1]
    itemsize = jnp.dtype(h.dtype).itemsize

    if tb is None:
        tb = _choose_tb(B, S, D, SZ, itemsize)

    # Pad the batch up to a multiple of tb so every block is sublane-aligned
    # (padded rows are zeros -> finite scores, zero output; sliced off below).
    Bp = ((B + tb - 1) // tb) * tb
    h_in = h if Bp == B else jnp.pad(h, ((0, Bp - B), (0, 0), (0, 0)))

    w2_row = w2.reshape(1, SZ)  # present W2 as a row for the VPU lane-reduce

    w_itemsize = jnp.dtype(w1.dtype).itemsize
    cost = pl.CostEstimate(
        flops=2 * Bp * S * D * SZ + 2 * Bp * S * SZ + 2 * Bp * S * D,
        transcendentals=Bp * S * SZ + Bp * S,          # tanh + exp
        bytes_accessed=(Bp * S * D + Bp * D) * itemsize
        + (D * SZ + 2 * SZ + 1) * w_itemsize,
    )

    out = pl.pallas_call(
        weighted_average_kernel,
        out_shape=jax.ShapeDtypeStruct((Bp, D), h.dtype),
        grid_spec=pltpu.PrefetchScalarGridSpec(
            num_scalar_prefetch=0,
            grid=(Bp // tb,),
            in_specs=[
                pl.BlockSpec((tb, S, D), lambda b: (b, 0, 0)),  # h batch tile
                pl.BlockSpec((D, SZ), lambda b: (0, 0)),        # W1 (transposed)
                pl.BlockSpec((1, SZ), lambda b: (0, 0)),        # b1
                pl.BlockSpec((1, SZ), lambda b: (0, 0)),        # W2 as a row
                pl.BlockSpec((1, 1), lambda b: (0, 0)),         # b2
            ],
            out_specs=pl.BlockSpec((tb, D), lambda b: (b, 0)),
        ),
        compiler_params=pltpu.CompilerParams(
            dimension_semantics=("parallel",),
            vmem_limit_bytes=48 << 20,  # fits v7x's 64 MiB; above default scoped
        ),
        cost_estimate=cost,
    )(h_in, w1, b1, w2_row, b2)
    return out[:B]


def weighted_average_ref(h, w1, b1, w2, b2):
    # pure-JAX reference mirroring the PyTorch forward
    z = jnp.tanh(h @ w1 + b1)                 # (B, S, SZ)
    s = z @ w2 + b2                           # (B, S, 1)
    alpha = jax.nn.softmax(s, axis=1)         # softmax over sequence
    return jnp.sum(alpha * h, axis=1)         # (B, D)


if __name__ == "__main__":
    B, S, D = 2, 8, 32
    SZ = D  # size defaults to size_in in the module

    key = jax.random.PRNGKey(0)
    k_h, k_w1, k_b1, k_w2, k_b2 = jax.random.split(key, 5)

    h = jax.random.normal(k_h, (B, S, D), dtype=jnp.float32)
    # deterministic parameter init (PyTorch-Linear-like uniform scale)
    lim1 = 1.0 / jnp.sqrt(D)
    lim2 = 1.0 / jnp.sqrt(SZ)
    w1 = jax.random.uniform(k_w1, (D, SZ), minval=-lim1, maxval=lim1, dtype=jnp.float32)
    b1 = jax.random.uniform(k_b1, (1, SZ), minval=-lim1, maxval=lim1, dtype=jnp.float32)
    w2 = jax.random.uniform(k_w2, (SZ, 1), minval=-lim2, maxval=lim2, dtype=jnp.float32)
    b2 = jax.random.uniform(k_b2, (1, 1), minval=-lim2, maxval=lim2, dtype=jnp.float32)

    out = weighted_average(h, w1, b1, w2, b2)
    out = jax.block_until_ready(out)

    ref = weighted_average_ref(h, w1, b1, w2, b2)
    assert out.shape == (B, D)
    # tolerance loosened for the approx (EUP vrcp) softmax denominator
    assert jnp.allclose(out, ref, atol=1e-2, rtol=1e-2), "mismatch vs reference"

    print("KERNEL_OK")
</pallas_src>

<mosaic_0001>
module attributes {stable_mosaic.version = 11 : i64} {
  func.func @weighted_average_kernel(%arg0: i32, %arg1: memref<8x8x32xf32, #tpu.memory_space<vmem>>, %arg2: memref<32x32xf32, #tpu.memory_space<vmem>>, %arg3: memref<1x32xf32, #tpu.memory_space<vmem>>, %arg4: memref<1x32xf32, #tpu.memory_space<vmem>>, %arg5: memref<1x1xf32, #tpu.memory_space<vmem>>, %arg6: memref<8x32xf32, #tpu.memory_space<vmem>>) attributes {dimension_semantics = [#tpu.dimension_semantics<parallel>], iteration_bounds = array<i64: 1>, scalar_prefetch = 0 : i64, scratch_operands = 0 : i64, tpu.core_type = #tpu.core_type<tc>, window_params = [{transform_indices = @transform_0, window_bounds = array<i64: 8, 8, 32>}, {pipeline_mode = #tpu.pipeline_mode<synchronous>, transform_indices = @transform_1, window_bounds = array<i64: 32, 32>}, {pipeline_mode = #tpu.pipeline_mode<synchronous>, transform_indices = @transform_2, window_bounds = array<i64: 1, 32>}, {pipeline_mode = #tpu.pipeline_mode<synchronous>, transform_indices = @transform_3, window_bounds = array<i64: 1, 32>}, {pipeline_mode = #tpu.pipeline_mode<synchronous>, transform_indices = @transform_4, window_bounds = array<i64: 1, 1>}, {transform_indices = @transform_5, window_bounds = array<i64: 8, 32>}]} {
    %c0 = arith.constant 0 : index
    %c0_0 = arith.constant 0 : index
    %c0_1 = arith.constant 0 : index
    %0 = vector.load %arg1[%c0, %c0_0, %c0_1] : memref<8x8x32xf32, #tpu.memory_space<vmem>>, vector<8x8x32xf32>
    %1 = vector.shape_cast %0 : vector<8x8x32xf32> to vector<64x32xf32>
    %c0_2 = arith.constant 0 : index
    %c0_3 = arith.constant 0 : index
    %2 = vector.load %arg2[%c0_2, %c0_3] : memref<32x32xf32, #tpu.memory_space<vmem>>, vector<32x32xf32>
    %cst = arith.constant dense<0.000000e+00> : vector<64x32xf32>
    %3 = tpu.matmul %1, %2, %cst {dimension_numbers = #tpu.dot_dimension_numbers<[1], [0], [0], [1], [0, 0, 1, 1], [], []>} : vector<64x32xf32>, vector<32x32xf32>, vector<64x32xf32> -> vector<64x32xf32>
    %c0_4 = arith.constant 0 : index
    %c0_5 = arith.constant 0 : index
    %4 = vector.load %arg3[%c0_4, %c0_5] : memref<1x32xf32, #tpu.memory_space<vmem>>, vector<1x32xf32>
    %5 = vector.broadcast %4 : vector<1x32xf32> to vector<64x32xf32>
    %6 = arith.addf %3, %5 : vector<64x32xf32>
    %7 = math.tanh %6 : vector<64x32xf32>
    %c0_6 = arith.constant 0 : index
    %c0_7 = arith.constant 0 : index
    %8 = vector.load %arg4[%c0_6, %c0_7] : memref<1x32xf32, #tpu.memory_space<vmem>>, vector<1x32xf32>
    %9 = vector.broadcast %8 : vector<1x32xf32> to vector<64x32xf32>
    %10 = arith.mulf %7, %9 : vector<64x32xf32>
    %cst_8 = arith.constant dense<0.000000e+00> : vector<64xf32>
    %11 = vector.multi_reduction <add>, %10, %cst_8 [1] : vector<64x32xf32> to vector<64xf32>
    %12 = vector.shape_cast %11 : vector<64xf32> to vector<64x1xf32>
    %c0_9 = arith.constant 0 : index
    %c0_10 = arith.constant 0 : index
    %13 = vector.load %arg5[%c0_9, %c0_10] : memref<1x1xf32, #tpu.memory_space<vmem>>, vector<1x1xf32>
    %14 = vector.broadcast %13 : vector<1x1xf32> to vector<64x1xf32>
    %15 = arith.addf %12, %14 : vector<64x1xf32>
    %16 = vector.shape_cast %15 : vector<64x1xf32> to vector<8x8x1xf32>
    %cst_11 = arith.constant dense<0xFF800000> : vector<8x1xf32>
    %17 = vector.multi_reduction <maximumf>, %16, %cst_11 [1] : vector<8x8x1xf32> to vector<8x1xf32>
    %18 = vector.shape_cast %17 : vector<8x1xf32> to vector<8x1x1xf32>
    %19 = vector.broadcast %18 : vector<8x1x1xf32> to vector<8x8x1xf32>
    %20 = arith.subf %16, %19 : vector<8x8x1xf32>
    %21 = math.exp %20 : vector<8x8x1xf32>
    %cst_12 = arith.constant dense<0.000000e+00> : vector<8x1xf32>
    %22 = vector.multi_reduction <add>, %21, %cst_12 [1] : vector<8x8x1xf32> to vector<8x1xf32>
    %23 = vector.shape_cast %22 : vector<8x1xf32> to vector<8x1x1xf32>
    %24 = tpu.reciprocal %23 {approx = true} : vector<8x1x1xf32> -> vector<8x1x1xf32>
    %25 = vector.broadcast %24 : vector<8x1x1xf32> to vector<8x8x1xf32>
    %26 = arith.mulf %21, %25 : vector<8x8x1xf32>
    %27 = vector.broadcast %26 : vector<8x8x1xf32> to vector<8x8x32xf32>
    %28 = arith.mulf %27, %0 : vector<8x8x32xf32>
    %cst_13 = arith.constant dense<0.000000e+00> : vector<8x32xf32>
    %29 = vector.multi_reduction <add>, %28, %cst_13 [1] : vector<8x8x32xf32> to vector<8x32xf32>
    %c0_14 = arith.constant 0 : index
    %c0_15 = arith.constant 0 : index
    %30 = vector.load %arg6[%c0_14, %c0_15] : memref<8x32xf32, #tpu.memory_space<vmem>>, vector<8x32xf32>
    tpu.vector_store %arg6[%c0_14, %c0_15], %29 {strides = array<i32>} : memref<8x32xf32, #tpu.memory_space<vmem>>, vector<8x32xf32>,
    return
  }
  func.func @transform_0(%arg0: i32) -> (i32, i32, i32) {
    %c0_i32 = arith.constant 0 : i32
    %c0_i32_0 = arith.constant 0 : i32
    %c0_i32_1 = arith.constant 0 : i32
    return %arg0, %c0_i32, %c0_i32_0 : i32, i32, i32
  }
  func.func @transform_1(%arg0: i32) -> (i32, i32) {
    %c0_i32 = arith.constant 0 : i32
    %c0_i32_0 = arith.constant 0 : i32
    %c0_i32_1 = arith.constant 0 : i32
    return %c0_i32, %c0_i32_0 : i32, i32
  }
  func.func @transform_2(%arg0: i32) -> (i32, i32) {
    %c0_i32 = arith.constant 0 : i32
    %c0_i32_0 = arith.constant 0 : i32
    %c0_i32_1 = arith.constant 0 : i32
    return %c0_i32, %c0_i32_0 : i32, i32
  }
  func.func @transform_3(%arg0: i32) -> (i32, i32) {
    %c0_i32 = arith.constant 0 : i32
    %c0_i32_0 = arith.constant 0 : i32
    %c0_i32_1 = arith.constant 0 : i32
    return %c0_i32, %c0_i32_0 : i32, i32
  }
  func.func @transform_4(%arg0: i32) -> (i32, i32) {
    %c0_i32 = arith.constant 0 : i32
    %c0_i32_0 = arith.constant 0 : i32
    %c0_i32_1 = arith.constant 0 : i32
    return %c0_i32, %c0_i32_0 : i32, i32
  }
  func.func @transform_5(%arg0: i32) -> (i32, i32) {
    %c0_i32 = arith.constant 0 : i32
    %c0_i32_0 = arith.constant 0 : i32
    return %arg0, %c0_i32 : i32, i32
  }
}

</mosaic_0001>

<bundles_post_ra>
// kernel: tpu_custom_call.1
= control target key start
LH: loop header
LB: loop body
LE: loop exit
PB: predicated region body
PF: predicated region fallthrough
CT: control target
= control target key end

     0   :  { %s920_s0 = inlined_call_operand.hbm [shape: f32[8,8,32], index: 0, kind: input, shape index: {}]   ;;  %s921_s1 = inlined_call_operand.hbm [shape: f32[32,32], index: 1, kind: input, shape index: {}]   ;;  %s922_s2 = inlined_call_operand.vmem [shape: f32[1,32], index: 2, kind: input, shape index: {}]   ;;  %s923_s3 = inlined_call_operand.vmem [shape: f32[1,32], index: 3, kind: input, shape index: {}]   ;;  %s924_s4 = inlined_call_operand.<no memory space> [shape: f32[1,1], index: 4, kind: input, shape index: {}]   ;;  %s925_s5 = inlined_call_operand.hbm [shape: f32[8,32], index: 5, kind: output, shape index: {}]  }
   0x1   :  { %v10_v0 = vstv %s924_s4 }
   0x2   :  { %11 = vst [vmem:[#allocation2] sm:$0x1] %v10_v0 }
   0x3   :  { %12 = vsyncpa [#allocation4], 0 }
   0x4   :  { %13 = vsyncpa [#allocation7], 0 }
   0x5   :  { %14 = vsyncpa [#allocation5], 0  ;;  %s742_s20 = smov [#allocation3]   ;;  %s670_s24 = scalar_lea.hbm %s920_s0, 1024 }
   0x6   :  { %s20_s21 = sshll.u32 %s742_s20, 4  ;;  %p671_p0 = scmp.ne.s32.totalorder %s920_s0, %s670_s24  ;;  %s21_s21 = int_to_ptr.vmem [resolvable:$true] %s20_s21 }
   0x7   :  { %p674_p1 = scmp.lt.u32.totalorder %s670_s24, %s920_s0 }
   0x9   :  { %p676_p2 = pnand %p674_p1, %p671_p0 }
   0xb   :  { %679 = shalt.err (!%p676_p2)
}
   0xc   :  { %s680_s4 = scalar_lea.vmem %s21_s21, 1024  ;;  %p685_p4 = scmp.lt.s32.totalorder %s21_s21, %s21_s21 }
   0xd   :  { %p681_p3 = scmp.ne.s32.totalorder %s21_s21, %s680_s4  ;;  %p686_p5 = scmp.lt.s32.totalorder %s680_s4, %s680_s4 }
   0xf   :  { %p687_p6 = por %p686_p5, %p685_p4 }
  0x11   :  { %p688_p7 = pnand %p687_p6, %p681_p3 }
  0x13   :  { %691 = shalt.err (!%p688_p7)
}
  0x14   :  { %s743_s29 = smov 128   ;;  %s744_s30 = smov 8  }
  0x15   :  { %26 = dma.hbm_to_vmem [thread:$0]  %s920_s0, 1024, %s21_s21, [#allocation4], %s743_s29, %s743_s29, %s744_s30  }
  0x16   :  { %s745_s8 = smov [#allocation6]   ;;  %s692_s12 = scalar_lea.hbm %s921_s1, 512 }
  0x17   :  { %s32_s9 = sshll.u32 %s745_s8, 4  ;;  %p693_p8 = scmp.ne.s32.totalorder %s921_s1, %s692_s12  ;;  %s33_s9 = int_to_ptr.vmem [resolvable:$true] %s32_s9 }
  0x18   :  { %p696_p9 = scmp.lt.u32.totalorder %s692_s12, %s921_s1 }
  0x1a   :  { %p698_p10 = pnand %p696_p9, %p693_p8 }
  0x1c   :  { %701 = shalt.err (!%p698_p10)
}
  0x1d   :  { %s702_s17 = scalar_lea.vmem %s33_s9, 512  ;;  %p707_p12 = scmp.lt.s32.totalorder %s33_s9, %s33_s9 }
  0x1e   :  { %p703_p11 = scmp.ne.s32.totalorder %s33_s9, %s702_s17  ;;  %p708_p13 = scmp.lt.s32.totalorder %s702_s17, %s702_s17 }
  0x20   :  { %p709_p0 = por %p708_p13, %p707_p12 }
  0x22   :  { %p710_p1 = pnand %p709_p0, %p703_p11 }
  0x24   :  { %713 = shalt.err (!%p710_p1)
}
  0x25   :  { %38 = dma.hbm_to_vmem [thread:$0]  %s921_s1, 512, %s33_s9, [#allocation7], %s743_s29, %s743_s29, %s744_s30  }
  0x26   :  { %736 = dma.done.wait [#allocation4], 1024  }
  0x27   :  { %737 = vsyncadd [#allocation4], 4294966272 }
  0x28   :  { %738 = dma.done.wait [#allocation7], 512  }
  0x29   :  { %739 = vsyncadd [#allocation7], 4294966784  ;;  %vm70_vm0 = vcmask 261120   ;;  %v59_v1 = vld [vmem:[#allocation6] sm:$0xff]  ;;  %v60_v2 = vld [vmem:[#allocation6 + $0x8] sm:$0xff]  ;;  %v746_v57 = vmov 0  }
  0x2a   :  { %v61_v3 = vld [vmem:[#allocation6 + $0x10] sm:$0xff]  ;;  %v602_v4 = vpack.c.bf16 %v60_v2, %v59_v1  ;;  %v62_v5 = vld [vmem:[#allocation6 + $0x18] sm:$0xff]  ;;  %v805_v6 = vld [vmem:[#allocation3] sm:$0xff]  ;;  %621 = vset.pattern.permute.xlu1 %v746_v57  ;;  %620 = vset.pattern.permute.xlu0 %v746_v57  ;;  %vm262_vm1 = vcmask 7168   ;;  %vm527_vm2 = vcmask 1041409   ;;  %vm529_vm3 = vcmask 1042434  }
  0x2b   :  { %v606_v7 = vpack.c.bf16 %v62_v5, %v61_v3  ;;  %590 = vmatprep.mubr.msk.f32.mxu0 %vm70_vm0, %v805_v6  ;;  %v809_v8 = vld [vmem:[#allocation3 + $0x20] sm:$0xff]  ;;  %v813_v9 = vld [vmem:[#allocation3 + $0x8] sm:$0xff]  ;;  %v817_v11 = vld [vmem:[#allocation3 + $0x10] sm:$0xff]  ;;  %vm531_vm4 = vcmask 1043459   ;;  %vm533_vm5 = vcmask 1044484   ;;  %vm535_vm6 = vcmask 1045509  }
  0x2c   :  { %603 = vmatprep.subr.bf16.mxu0 %v602_v4  ;;  %610 = vmatprep.subr.bf16.mxu1 %v602_v4  ;;  %v815_v10 = vld [vmem:[#allocation3 + $0x28] sm:$0xff]  ;;  %v819_v12 = vld [vmem:[#allocation3 + $0x30] sm:$0xff]  ;;  %v827_v13 = vld [vmem:[#allocation3 + $0x18] sm:$0xff]  ;;  %vm537_vm7 = vcmask 1046534   ;;  %vm539_vm8 = vcmask 1047559  }
  0x2d   :  { %605 = vmatpush3.bf16.msra.mxu0 %v602_v4  ;;  %612 = vmatpush3.bf16.msra.mxu1 %v602_v4  ;;  %v831_v14 = vld [vmem:[#allocation3 + $0x38] sm:$0xff] }
  0x2e   :  { %607 = vmatprep.subr.bf16.mxu0 %v606_v7  ;;  %611 = vmatprep.subr.bf16.mxu1 %v606_v7  ;;  %v559_v15 = vld [vmem:[%s922_s2] ss:$0 sm:$0xff] }
  0x2f   :  { %596 = vmatprep.mubr.msk.f32.mxu1 %vm70_vm0, %v809_v8  ;;  %v568_v32 = vld [vmem:[%s923_s3] ss:$0 sm:$0xff]  ;;  %s747_s3 = smov [#allocation8]  }
  0x30   :  { %v569_v58 = vld [vmem:[#allocation2] ss:$0 sm:$0xff]  ;;  %s549_s21 = sshll.u32 %s747_s3, 4  ;;  %s550_s21 = int_to_ptr.vmem [resolvable:$true] %s549_s21 }
  0x31   :  { %609 = vmatpush3.bf16.msra.mxu0 %v606_v7  ;;  %613 = vmatpush3.bf16.msra.mxu1 %v606_v7  ;;  %s714_s22 = scalar_lea.vmem %s550_s21, 128  ;;  %p719_p3 = scmp.lt.s32.totalorder %s550_s21, %s550_s21 }
  0x32   :  { %p715_p2 = scmp.ne.s32.totalorder %s550_s21, %s714_s22  ;;  %p720_p4 = scmp.lt.s32.totalorder %s714_s22, %s714_s22 }
  0x34   :  { %591 = vmatmul.mubr.msk.f32.vlgmr.msra.gmra.mrb[0].mxu0 %vm70_vm0, %v813_v9  ;;  %597 = vmatmul.mubr.msk.f32.vlgmr.msra.gmra.mrb[0].mxu1 %vm70_vm0, %v815_v10  ;;  %p721_p5 = por %p720_p4, %p719_p3 }
  0x35   :  { %593 = vmatprep.mubr.msk.f32.mxu0 %vm70_vm0, %v817_v11  ;;  %599 = vmatprep.mubr.msk.f32.mxu1 %vm70_vm0, %v819_v12 }
  0x36   :  { %p722_p6 = pnand %p721_p5, %p715_p2 }
  0x38   :  { %594 = vmatmul.mubr.msk.f32.gmra.mrb[2].mxu0 %vm70_vm0, %v827_v13  ;;  %600 = vmatmul.mubr.msk.f32.gmra.mrb[2].mxu1 %vm70_vm0, %v831_v14 }
 0x107   :  { %v592_v16 = vpop.f32.mrb[0].mxu0  ;;  %v598_v17 = vpop.f32.mrb[0].mxu1 }
 0x108   :  { %v167_v18 = vadd.f32 %v592_v16, %v559_v15  ;;  %v161_v19 = vpop.f32.mrb[1].mxu0  ;;  %v181_v20 = vpop.f32.mrb[1].mxu1  ;;  %v187_v27 = vadd.f32 %v598_v17, %v559_v15 }
 0x109   :  { %v162_v21 = vadd.f32 %v559_v15, %v161_v19  ;;  %v182_v22 = vadd.f32 %v559_v15, %v181_v20 }
 0x10a   :  { %622 = vtanh.f32 %v167_v18 }
 0x10b   :  { %624 = vtanh.f32 %v162_v21  ;;  %v595_v23 = vpop.f32.mrb[2].mxu0  ;;  %v601_v24 = vpop.f32.mrb[2].mxu1 }
 0x10c   :  { %v177_v25 = vadd.f32 %v595_v23, %v559_v15  ;;  %v171_v26 = vpop.f32.mrb[3].mxu0  ;;  %v191_v28 = vpop.f32.mrb[3].mxu1  ;;  %626 = vtanh.f32 %v182_v22  ;;  %v197_v31 = vadd.f32 %v601_v24, %v559_v15 }
 0x10d   :  { %v172_v29 = vadd.f32 %v559_v15, %v171_v26  ;;  %v192_v30 = vadd.f32 %v559_v15, %v191_v28 }
 0x10e   :  { %628 = vtanh.f32 %v177_v25 }
 0x10f   :  { %630 = vtanh.f32 %v172_v29 }
 0x110   :  { %632 = vtanh.f32 %v187_v27 }
 0x111   :  { %634 = vtanh.f32 %v192_v30 }
 0x112   :  { %636 = vtanh.f32 %v197_v31 }
 0x114   :  { %v623_v33 = vpop.eup %622 }
 0x115   :  { %v625_v34 = vpop.eup %624  ;;  %v216_v35 = vmul.f32 %v623_v33, %v568_v32 }
 0x116   :  { %v627_v36 = vpop.eup %626  ;;  %v215_v38 = vmul.f32 %v625_v34, %v568_v32 }
 0x117   :  { %v226_v37 = vsel %vm70_vm0, %v216_v35, 0.0  ;;  %v219_v42 = vmul.f32 %v627_v36, %v568_v32 }
 0x118   :  { %v629_v39 = vpop.eup %628  ;;  %227 = vadd.xlane.f32.xlu0 %v226_v37  ;;  %v223_v46 = vsel %vm70_vm0, %v215_v38, 0.0 }
 0x119   :  { %v631_v40 = vpop.eup %630  ;;  %v218_v41 = vmul.f32 %v629_v39, %v568_v32  ;;  %v235_v48 = vsel %vm70_vm0, %v219_v42, 0.0 }
 0x11a   :  { %v633_v43 = vpop.eup %632  ;;  %v217_v47 = vmul.f32 %v631_v40, %v568_v32 }
 0x11b   :  { %v635_v44 = vpop.eup %634  ;;  %v232_v45 = vsel %vm70_vm0, %v218_v41, 0.0  ;;  %v220_v49 = vmul.f32 %v633_v43, %v568_v32 }
 0x11c   :  { %233 = vadd.xlane.f32.xlu1 %v232_v45  ;;  %224 = vadd.xlane.f32.xlu0 %v223_v46  ;;  %v221_v50 = vmul.f32 %v635_v44, %v568_v32  ;;  %v637_v51 = vpop.eup %636  ;;  %v229_v52 = vsel %vm70_vm0, %v217_v47, 0.0 }
 0x11d   :  { %v238_v53 = vsel %vm70_vm0, %v220_v49, 0.0  ;;  %v222_v55 = vmul.f32 %v637_v51, %v568_v32 }
 0x11e   :  { %v241_v54 = vsel %vm70_vm0, %v221_v50, 0.0 }
 0x11f   :  { %v244_v56 = vsel %vm70_vm0, %v222_v55, 0.0 }
 0x120   :  { %230 = vadd.xlane.f32.xlu1 %v229_v52  ;;  %236 = vadd.xlane.f32.xlu0 %v235_v48 }
 0x124   :  { %239 = vadd.xlane.f32.xlu1 %v238_v53  ;;  %242 = vadd.xlane.f32.xlu0 %v241_v54 }
 0x128   :  { %245 = vadd.xlane.f32.xlu1 %v244_v56 }
 0x1a5   :  { %v228_v59 = vpop.xlane.xlu0 %227 }
 0x1a6   :  { %v255_v60 = vadd.f32 %v569_v58, %v228_v59 }
 0x1a8   :  { %v270_v61 = vsel %vm262_vm1, %v255_v60, -inf }
 0x1a9   :  { %v271_v62 = vrot.slane %v270_v61, 4  ;;  %v234_v63 = vpop.xlane.xlu1 %233  ;;  %v225_v0 = vpop.xlane.xlu0 %224 }
 0x1aa   :  { %v257_v1 = vadd.f32 %v569_v58, %v234_v63  ;;  %v254_v2 = vadd.f32 %v569_v58, %v225_v0 }
 0x1ab   :  { %v272_v3 = vmax.f32 %v270_v61, %v271_v62 }
 0x1ac   :  { %v284_v4 = vsel %vm262_vm1, %v257_v1, -inf  ;;  %v263_v5 = vsel %vm262_vm1, %v254_v2, -inf }
 0x1ad   :  { %v273_v7 = vrot.slane %v272_v3, 2  ;;  %v285_v15 = vrot.slane %v284_v4, 4  ;;  %v264_v16 = vrot.slane %v263_v5, 4  ;;  %v231_v17 = vpop.xlane.xlu1 %230  ;;  %v237_v18 = vpop.xlane.xlu0 %236 }
 0x1ae   :  { %v256_v19 = vadd.f32 %v569_v58, %v231_v17  ;;  %v258_v20 = vadd.f32 %v569_v58, %v237_v18 }
 0x1af   :  { %v274_v21 = vmax.f32 %v272_v3, %v273_v7  ;;  %v286_v22 = vmax.f32 %v284_v4, %v285_v15  ;;  %v265_v23 = vmax.f32 %v263_v5, %v264_v16 }
 0x1b0   :  { %v277_v24 = vsel %vm262_vm1, %v256_v19, -inf  ;;  %v291_v25 = vsel %vm262_vm1, %v258_v20, -inf }
 0x1b1   :  { %v275_v26 = vrot.slane %v274_v21, 1  ;;  %v287_v27 = vrot.slane %v286_v22, 2  ;;  %v266_v28 = vrot.slane %v265_v23, 2  ;;  %v278_v29 = vrot.slane %v277_v24, 4  ;;  %v240_v30 = vpop.xlane.xlu1 %239  ;;  %v243_v31 = vpop.xlane.xlu0 %242 }
 0x1b2   :  { %v292_v32 = vrot.slane %v291_v25, 4  ;;  %v259_v33 = vadd.f32 %v569_v58, %v240_v30  ;;  %v260_v34 = vadd.f32 %v569_v58, %v243_v31 }
 0x1b3   :  { %v276_v35 = vmax.f32 %v274_v21, %v275_v26  ;;  %v288_v36 = vmax.f32 %v286_v22, %v287_v27  ;;  %v267_v37 = vmax.f32 %v265_v23, %v266_v28  ;;  %v279_v38 = vmax.f32 %v277_v24, %v278_v29 }
 0x1b4   :  { %v293_v39 = vmax.f32 %v291_v25, %v292_v32  ;;  %v298_v40 = vsel %vm262_vm1, %v259_v33, -inf  ;;  %v305_v41 = vsel %vm262_vm1, %v260_v34, -inf }
 0x1b5   :  { %v320_v42 = vsub.f32 %v255_v60, %v276_v35  ;;  %v289_v43 = vrot.slane %v288_v36, 1  ;;  %v268_v44 = vrot.slane %v267_v37, 1  ;;  %v280_v45 = vrot.slane %v279_v38, 2  ;;  %v246_v46 = vpop.xlane.xlu1 %245 }
 0x1b6   :  { %v294_v47 = vrot.slane %v293_v39, 2  ;;  %v299_v48 = vrot.slane %v298_v40, 4  ;;  %v306_v49 = vrot.slane %v305_v41, 4  ;;  %v261_v50 = vadd.f32 %v569_v58, %v246_v46 }
 0x1b7   :  { %v329_v51 = vmul.f32 1.442695, %v320_v42  ;;  %v290_v52 = vmax.f32 %v288_v36, %v289_v43  ;;  %v269_v53 = vmax.f32 %v267_v37, %v268_v44  ;;  %v281_v54 = vmax.f32 %v279_v38, %v280_v45 }
 0x1b8   :  { %v295_v55 = vmax.f32 %v293_v39, %v294_v47  ;;  %v300_v56 = vmax.f32 %v298_v40, %v299_v48  ;;  %v307_v57 = vmax.f32 %v305_v41, %v306_v49  ;;  %v312_v59 = vsel %vm262_vm1, %v261_v50, -inf }
 0x1b9   :  { %638 = vpow2.f32 %v329_v51  ;;  %v322_v61 = vsub.f32 %v257_v1, %v290_v52  ;;  %v319_v60 = vsub.f32 %v254_v2, %v269_v53  ;;  %v282_v62 = vrot.slane %v281_v54, 1 }
 0x1ba   :  { %v296_v63 = vrot.slane %v295_v55, 1  ;;  %v301_v0 = vrot.slane %v300_v56, 2  ;;  %v308_v3 = vrot.slane %v307_v57, 2  ;;  %v313_v4 = vrot.slane %v312_v59, 4 }
 0x1bb   :  { %v333_v5 = vmul.f32 1.442695, %v322_v61  ;;  %v327_v7 = vmul.f32 1.442695, %v319_v60  ;;  %v283_v58 = vmax.f32 %v281_v54, %v282_v62 }
 0x1bc   :  { %v297_v15 = vmax.f32 %v295_v55, %v296_v63  ;;  %v302_v16 = vmax.f32 %v300_v56, %v301_v0  ;;  %v309_v17 = vmax.f32 %v307_v57, %v308_v3  ;;  %v314_v18 = vmax.f32 %v312_v59, %v313_v4 }
 0x1bd   :  { %640 = vpow2.f32 %v333_v5  ;;  %v321_v21 = vsub.f32 %v256_v19, %v283_v58 }
 0x1be   :  { %642 = vpow2.f32 %v327_v7  ;;  %v323_v22 = vsub.f32 %v258_v20, %v297_v15  ;;  %v303_v23 = vrot.slane %v302_v16, 1  ;;  %v310_v24 = vrot.slane %v309_v17, 1 }
 0x1bf   :  { %v331_v1 = vmul.f32 1.442695, %v321_v21  ;;  %v315_v2 = vrot.slane %v314_v18, 2 }
 0x1c0   :  { %v335_v25 = vmul.f32 1.442695, %v323_v22  ;;  %v304_v26 = vmax.f32 %v302_v16, %v303_v23  ;;  %v311_v27 = vmax.f32 %v309_v17, %v310_v24 }
 0x1c1   :  { %644 = vpow2.f32 %v331_v1  ;;  %v316_v28 = vmax.f32 %v314_v18, %v315_v2 }
 0x1c2   :  { %646 = vpow2.f32 %v335_v25  ;;  %v324_v29 = vsub.f32 %v259_v33, %v304_v26  ;;  %v325_v30 = vsub.f32 %v260_v34, %v311_v27 }
 0x1c3   :  { %v859_v31 = vpop.eup %638  ;;  %v317_v32 = vrot.slane %v316_v28, 1 }
 0x1c4   :  { %v350_v19 = vsel %vm262_vm1, %v859_v31, 0.0  ;;  %v337_v35 = vmul.f32 1.442695, %v324_v29  ;;  %v339_v20 = vmul.f32 1.442695, %v325_v30 }
 0x1c5   :  { %v351_v36 = vrot.slane %v350_v19, 4  ;;  %v318_v37 = vmax.f32 %v316_v28, %v317_v32 }
 0x1c6   :  { %648 = vpow2.f32 %v337_v35 }
 0x1c7   :  { %v863_v38 = vpop.eup %640  ;;  %v352_v39 = vadd.f32 %v351_v36, %v350_v19  ;;  %650 = vpow2.f32 %v339_v20  ;;  %v326_v40 = vsub.f32 %v261_v50, %v318_v37 }
 0x1c8   :  { %v865_v41 = vpop.eup %642  ;;  %v364_v33 = vsel %vm262_vm1, %v863_v38, 0.0 }
 0x1c9   :  { %v353_v34 = vrot.slane %v352_v39, 2  ;;  %v343_v42 = vsel %vm262_vm1, %v865_v41, 0.0  ;;  %v341_v43 = vmul.f32 1.442695, %v326_v40  ;;  %v365_v46 = vrot.slane %v364_v33, 4 }
 0x1ca   :  { %v344_v44 = vrot.slane %v343_v42, 4 }
 0x1cb   :  { %v871_v45 = vpop.eup %644  ;;  %652 = vpow2.f32 %v341_v43  ;;  %v354_v47 = vadd.f32 %v353_v34, %v352_v39  ;;  %v366_v55 = vadd.f32 %v365_v46, %v364_v33 }
 0x1cc   :  { %v873_v48 = vpop.eup %646  ;;  %v345_v49 = vadd.f32 %v344_v44, %v343_v42  ;;  %v357_v50 = vsel %vm262_vm1, %v871_v45, 0.0 }
 0x1cd   :  { %v371_v51 = vsel %vm262_vm1, %v873_v48, 0.0  ;;  %v355_v52 = vrot.slane %v354_v47, 1  ;;  %v358_v56 = vrot.slane %v357_v50, 4  ;;  %v367_v7 = vrot.slane %v366_v55, 2 }
 0x1ce   :  { %v346_v53 = vrot.slane %v345_v49, 2  ;;  %v372_v54 = vrot.slane %v371_v51, 4 }
 0x1cf   :  { %v356_v57 = vadd.f32 %v355_v52, %v354_v47  ;;  %v359_v58 = vadd.f32 %v358_v56, %v357_v50  ;;  %v368_v2 = vadd.f32 %v367_v7, %v366_v55 }
 0x1d0   :  { %v649_v59 = vpop.eup %648  ;;  %v373_v61 = vadd.f32 %v372_v54, %v371_v51  ;;  %v347_v60 = vadd.f32 %v346_v53, %v345_v49 }
 0x1d1   :  { %v879_v62 = vpop.eup %650  ;;  %v378_v63 = vsel %vm262_vm1, %v649_v59, 0.0  ;;  %654 = vrcp.f32 %v356_v57  ;;  %v360_v24 = vrot.slane %v359_v58, 2  ;;  %v369_v32 = vrot.slane %v368_v2, 1 }
 0x1d2   :  { %v374_v0 = vrot.slane %v373_v61, 2  ;;  %v379_v3 = vrot.slane %v378_v63, 4  ;;  %v385_v4 = vsel %vm262_vm1, %v879_v62, 0.0  ;;  %v348_v5 = vrot.slane %v347_v60, 1 }
 0x1d3   :  { %v386_v15 = vrot.slane %v385_v4, 4  ;;  %v361_v19 = vadd.f32 %v360_v24, %v359_v58  ;;  %v370_v39 = vadd.f32 %v369_v32, %v368_v2 }
 0x1d4   :  { %v380_v16 = vadd.f32 %v379_v3, %v378_v63  ;;  %v349_v17 = vadd.f32 %v348_v5, %v347_v60  ;;  %v375_v18 = vadd.f32 %v374_v0, %v373_v61 }
 0x1d5   :  { %v653_v21 = vpop.eup %652  ;;  %v387_v1 = vadd.f32 %v386_v15, %v385_v4  ;;  %v362_v34 = vrot.slane %v361_v19, 1 }
 0x1d6   :  { %v381_v22 = vrot.slane %v380_v16, 2  ;;  %v392_v23 = vsel %vm262_vm1, %v653_v21, 0.0  ;;  %656 = vrcp.f32 %v349_v17  ;;  %v376_v27 = vrot.slane %v375_v18, 1 }
 0x1d7   :  { %v393_v25 = vrot.slane %v392_v23, 4  ;;  %v388_v30 = vrot.slane %v387_v1, 2  ;;  %v363_v44 = vadd.f32 %v362_v34, %v361_v19 }
 0x1d8   :  { %v382_v26 = vadd.f32 %v381_v22, %v380_v16  ;;  %v377_v37 = vadd.f32 %v376_v27, %v375_v18 }
 0x1d9   :  { %v394_v35 = vadd.f32 %v393_v25, %v392_v23  ;;  %v389_v42 = vadd.f32 %v388_v30, %v387_v1 }
 0x1da   :  { %v383_v28 = vrot.slane %v382_v26, 1 }
 0x1db   :  { %v655_v29 = vpop.eup %654  ;;  %v395_v33 = vrot.slane %v394_v35, 2  ;;  %v390_v46 = vrot.slane %v389_v42, 1 }
 0x1dc   :  { %v408_v20 = vmul.f32 %v655_v29, %v859_v31  ;;  %v384_v36 = vadd.f32 %v383_v28, %v382_v26 }
 0x1dd   :  { %v396_v47 = vadd.f32 %v395_v33, %v394_v35  ;;  %v391_v31 = vadd.f32 %v390_v46, %v389_v42 }
 0x1de   :  { %422 = vperm.xlu1 %621, %v408_v20   ;;  %658 = vrcp.f32 %v384_v36 }
 0x1df   :  { %660 = vrcp.f32 %v377_v37  ;;  %v397_v50 = vrot.slane %v396_v47, 1 }
 0x1e0   :  { %v657_v40 = vpop.eup %656  ;;  %662 = vrcp.f32 %v370_v39 }
 0x1e1   :  { %v407_v43 = vmul.f32 %v657_v40, %v865_v41  ;;  %664 = vrcp.f32 %v363_v44  ;;  %v398_v53 = vadd.f32 %v397_v50, %v396_v47 }
 0x1e2   :  { %666 = vrcp.f32 %v391_v31 }
 0x1e3   :  { %417 = vperm.xlu0 %620, %v407_v43   ;;  %668 = vrcp.f32 %v398_v53 }
 0x1e8   :  { %v659_v49 = vpop.eup %658 }
 0x1e9   :  { %v412_v51 = vmul.f32 %v659_v49, %v649_v59  ;;  %v661_v52 = vpop.eup %660 }
 0x1ea   :  { %v411_v54 = vmul.f32 %v661_v52, %v873_v48  ;;  %v663_v55 = vpop.eup %662 }
 0x1eb   :  { %442 = vperm.xlu1 %621, %v412_v51   ;;  %v410_v41 = vmul.f32 %v663_v55, %v863_v38  ;;  %v665_v56 = vpop.eup %664 }
 0x1ec   :  { %v409_v57 = vmul.f32 %v665_v56, %v871_v45  ;;  %v667_v61 = vpop.eup %666 }
 0x1ed   :  { %v413_v60 = vmul.f32 %v667_v61, %v879_v62  ;;  %v669_v59 = vpop.eup %668 }
 0x1ee   :  { %v414_v63 = vmul.f32 %v669_v59, %v653_v21 }
 0x1ef   :  { %437 = vperm.xlu1 %621, %v411_v54  }
 0x1f3   :  { %432 = vperm.xlu1 %621, %v410_v41  }
 0x1f7   :  { %427 = vperm.xlu1 %621, %v409_v57  }
 0x1fb   :  { %447 = vperm.xlu1 %621, %v413_v60  }
 0x1ff   :  { %452 = vperm.xlu1 %621, %v414_v63  }
 0x25d   :  { %v423_v3 = vpop.permute.xlu1 %422 }
 0x25e   :  { %v456_v4 = vmul.f32 %v423_v3, %v813_v9 }
 0x260   :  { %v470_v7 = vsel %vm70_vm0, %v456_v4, 0.0 }
 0x261   :  { %v471_v62 = vrot.slane %v470_v7, 4 }
 0x262   :  { %v418_v0 = vpop.permute.xlu0 %417 }
 0x263   :  { %v455_v48 = vmul.f32 %v418_v0, %v805_v6  ;;  %v472_v9 = vadd.f32 %v471_v62, %v470_v7 }
 0x265   :  { %v463_v38 = vsel %vm70_vm0, %v455_v48, 0.0  ;;  %v473_v27 = vrot.slane %v472_v9, 2 }
 0x266   :  { %v464_v45 = vrot.slane %v463_v38, 4 }
 0x268   :  { %v465_v17 = vadd.f32 %v464_v45, %v463_v38 }
 0x26a   :  { %v443_v5 = vpop.permute.xlu1 %442  ;;  %v466_v1 = vrot.slane %v465_v17, 2 }
 0x26b   :  { %v460_v58 = vmul.f32 %v443_v5, %v815_v10 }
 0x26c   :  { %v467_v30 = vadd.f32 %v466_v1, %v465_v17 }
 0x26d   :  { %v498_v18 = vsel %vm70_vm0, %v460_v58, 0.0 }
 0x26e   :  { %v438_v15 = vpop.permute.xlu1 %437  ;;  %v499_v24 = vrot.slane %v498_v18, 4  ;;  %v468_v33 = vrot.slane %v467_v30, 1 }
 0x26f   :  { %v459_v16 = vmul.f32 %v438_v15, %v809_v8 }
 0x270   :  { %v500_v28 = vadd.f32 %v499_v24, %v498_v18  ;;  %v469_v52 = vadd.f32 %v468_v33, %v467_v30 }
 0x271   :  { %v491_v21 = vsel %vm70_vm0, %v459_v16, 0.0 }
 0x272   :  { %v492_v6 = vrot.slane %v491_v21, 4  ;;  %v433_v22 = vpop.permute.xlu1 %432  ;;  %v501_v39 = vrot.slane %v500_v28, 2 }
 0x273   :  { %v458_v23 = vmul.f32 %v433_v22, %v827_v13  ;;  %v474_v13 = vadd.f32 %v473_v27, %v472_v9 }
 0x274   :  { %v493_v25 = vadd.f32 %v492_v6, %v491_v21  ;;  %v502_v31 = vadd.f32 %v501_v39, %v500_v28 }
 0x275   :  { %v484_v2 = vsel %vm70_vm0, %v458_v23, 0.0  ;;  %v475_v47 = vrot.slane %v474_v13, 1 }
 0x276   :  { %v485_v10 = vrot.slane %v484_v2, 4  ;;  %v428_v26 = vpop.permute.xlu1 %427  ;;  %v494_v19 = vrot.slane %v493_v25, 2  ;;  %v503_v61 = vrot.slane %v502_v31, 1 }
 0x277   :  { %v457_v8 = vmul.f32 %v428_v26, %v817_v11  ;;  %v476_v57 = vadd.f32 %v475_v47, %v474_v13 }
 0x278   :  { %v486_v29 = vadd.f32 %v485_v10, %v484_v2  ;;  %v495_v43 = vadd.f32 %v494_v19, %v493_v25  ;;  %v504_v7 = vadd.f32 %v503_v61, %v502_v31 }
 0x279   :  { %v477_v32 = vsel %vm70_vm0, %v457_v8, 0.0 }
 0x27a   :  { %v487_v35 = vrot.slane %v486_v29, 2  ;;  %v478_v20 = vrot.slane %v477_v32, 4  ;;  %v448_v36 = vpop.permute.xlu1 %447  ;;  %v496_v54 = vrot.slane %v495_v43, 1 }
 0x27b   :  { %v461_v37 = vmul.f32 %v448_v36, %v819_v12 }
 0x27c   :  { %v479_v40 = vadd.f32 %v478_v20, %v477_v32  ;;  %v488_v34 = vadd.f32 %v487_v35, %v486_v29  ;;  %v497_v3 = vadd.f32 %v496_v54, %v495_v43 }
 0x27d   :  { %v505_v42 = vsel %vm70_vm0, %v461_v37, 0.0 }
 0x27e   :  { %v480_v11 = vrot.slane %v479_v40, 2  ;;  %v506_v44 = vrot.slane %v505_v42, 4  ;;  %v453_v46 = vpop.permute.xlu1 %452  ;;  %v489_v53 = vrot.slane %v488_v34, 1 }
 0x27f   :  { %v462_v49 = vmul.f32 %v453_v46, %v831_v14  ;;  %v528_v14 = vsel %vm527_vm2, %v476_v57, %v469_v52 }
 0x280   :  { %v481_v50 = vadd.f32 %v480_v11, %v479_v40  ;;  %v507_v51 = vadd.f32 %v506_v44, %v505_v42  ;;  %v490_v0 = vadd.f32 %v489_v53, %v488_v34 }
 0x281   :  { %v512_v12 = vsel %vm70_vm0, %v462_v49, 0.0 }
 0x282   :  { %v482_v55 = vrot.slane %v481_v50, 1  ;;  %v508_v41 = vrot.slane %v507_v51, 2  ;;  %v513_v56 = vrot.slane %v512_v12, 4 }
 0x284   :  { %v483_v60 = vadd.f32 %v482_v55, %v481_v50  ;;  %v509_v59 = vadd.f32 %v508_v41, %v507_v51  ;;  %v514_v63 = vadd.f32 %v513_v56, %v512_v12 }
 0x286   :  { %v530_v48 = vsel %vm529_vm3, %v483_v60, %v528_v14  ;;  %v510_v4 = vrot.slane %v509_v59, 1  ;;  %v515_v38 = vrot.slane %v514_v63, 2 }
 0x287   :  { %v532_v5 = vsel %vm531_vm4, %v490_v0, %v530_v48 }
 0x288   :  { %v516_v45 = vadd.f32 %v515_v38, %v514_v63  ;;  %v534_v58 = vsel %vm533_vm5, %v497_v3, %v532_v5  ;;  %v511_v15 = vadd.f32 %v510_v4, %v509_v59 }
 0x289   :  { %v536_v16 = vsel %vm535_vm6, %v504_v7, %v534_v58 }
 0x28a   :  { %v517_v62 = vrot.slane %v516_v45, 1  ;;  %v538_v18 = vsel %vm537_vm7, %v511_v15, %v536_v16 }
 0x28c   :  { %v518_v17 = vadd.f32 %v517_v62, %v516_v45 }
 0x28e   :  { %v540_v21 = vsel %vm539_vm8, %v518_v17, %v538_v18 }
 0x28f   :  { %542 = vst.msk [vmem:[#allocation8] sm:$0xff] %vm70_vm0, %v540_v21 }
 0x290   :  { %725 = shalt.err (!%p722_p6)
}
 0x291   :  { %s726_s25 = scalar_lea.hbm %s925_s5, 128 }
 0x292   :  { %p727_p7 = scmp.ne.s32.totalorder %s925_s5, %s726_s25  ;;  %p730_p8 = scmp.lt.u32.totalorder %s726_s25, %s925_s5 }
 0x294   :  { %p732_p9 = pnand %p730_p8, %p727_p7 }
 0x296   :  { %735 = shalt.err (!%p732_p9)
}
 0x297   :  { %552 = dma.vmem_to_hbm [thread:$0]  %s550_s21, 128, %s925_s5, [#allocation5]  }
 0x298   :  { %740 = dma.done.wait [#allocation5], 128  }
 0x299   :  { %741 = vsyncadd [#allocation5], 4294967168 }
 0x29a   :  { %556 = vsyncpa [#allocation4], 1 }
 0x29b   :  { %557 = vsyncpa [#allocation7], 1 }
 0x29c   :  { %558 = vsyncpa [#allocation5], 1 }

</bundles_post_ra>
